<compile_context>
chip_gen: v5e
topology: v5e:2x2
jax: 0.10.0
libtpu: 0.0.40
codegen_flags: <defaults>
</compile_context>

<pallas_src>
import functools
import numpy as np
import jax
import jax.numpy as jnp
from jax import lax
from jax.experimental import pallas as pl
from jax.experimental.pallas import tpu as pltpu


def _round_up(x, m):
    return ((x + m - 1) // m) * m


def _assembly_kernel(patches_ref, tmpl_ref, out_ref, *,
                     num_states, num_poses, batch_tile, l_pad):
    """One grid step = one batch tile.

    patches_ref : (TB*L_pad, K_pad)  im2col patches for TB images, row-major
                                     by image (padded rows duplicate valid
                                     rows, padded K columns are zero)
    tmpl_ref    : (K_pad, N_pad)     all templates, lane = state*P + pose
                                     (padded K rows / lanes >= S*P are zero)
    out_ref     : (TB, S)            per-state scores for this batch tile
    """
    # Single lane-dense MXU GEMM: every (position, state, pose) response.
    scores = jnp.dot(patches_ref[...], tmpl_ref[...],
                     preferred_element_type=jnp.float32)    # (TB*L_pad, N_pad)
    n_pad = scores.shape[-1]

    # Max over spatial positions: sublane reduce on a lane-dense tile.
    # (Padded position rows are duplicates of valid rows -> max unchanged.)
    scores = scores.reshape(batch_tile, l_pad, n_pad)
    red = jnp.max(scores, axis=1)                            # (TB, N_pad)

    # Segmented lane max: lanes [s*P, (s+1)*P) belong to state s.  Padded
    # lanes (>= S*P) never fall inside a segment, so no -inf mask is needed.
    lane = lax.broadcasted_iota(jnp.int32, (batch_tile, n_pad), 1)
    out_lane = lax.broadcasted_iota(jnp.int32, (batch_tile, num_states), 1)
    out = jnp.full((batch_tile, num_states), -jnp.inf, dtype=jnp.float32)
    for s in range(num_states):                              # S is static
        lo, hi = s * num_poses, (s + 1) * num_poses
        seg = jnp.where((lane >= lo) & (lane < hi), red, -jnp.inf)
        m = jnp.max(seg, axis=-1, keepdims=True)             # (TB, 1)
        out = jnp.where(out_lane == s, m, out)
    out_ref[...] = out.astype(out_ref.dtype)


def assembly_classifier_forward(inputs, templates, *, batch_tile=None):
    """Pallas implementation of AssemblyClassifier.forward.

    inputs    : (1, B, C, H, W) float32
    templates : (S, P, C, kH, kW) float32
    returns   : (1, B, S) float32
    """
    x = inputs[0]                                  # (B, C, H, W)
    B, C, H, W = x.shape
    S, P, C2, kH, kW = templates.shape
    assert C == C2
    oh, ow = H - kH + 1, W - kW + 1                # 'VALID' conv output size
    L = oh * ow
    K = C * kH * kW
    N = S * P

    # ---- glue: im2col with k ordered (c, i, j), matching template flatten.
    # TODO(synk): for large images on v5e, move im2col into the kernel (DMA
    # the raw image and build patches in VMEM) to avoid HBM read inflation.
    cols = []
    for i in range(kH):
        for j in range(kW):
            cols.append(x[:, :, i:i + oh, j:j + ow])          # (B, C, oh, ow)
    patches = jnp.stack(cols, axis=2)                         # (B, C, kH*kW, oh, ow)
    patches = patches.reshape(B, K, L)
    patches = jnp.transpose(patches, (0, 2, 1))               # (B, L, K)

    L_pad = _round_up(L, 8)
    K_pad = _round_up(K, 128)
    N_pad = _round_up(N, 128)

    # L padding replicates the last valid row (max-invariant, no row mask);
    # K padding is zero (no dot contribution).
    patches = jnp.pad(patches, ((0, 0), (0, L_pad - L), (0, 0)), mode='edge')
    patches = jnp.pad(patches, ((0, 0), (0, 0), (0, K_pad - K)))
    patches = patches.reshape(B * L_pad, K_pad)               # batch folded into M

    # All templates as one lane-dense RHS: lane = state*P + pose.
    T = templates.reshape(N, K)
    T = jnp.pad(T, ((0, N_pad - N), (0, K_pad - K)))
    T = jnp.transpose(T, (1, 0))                              # (K_pad, N_pad)

    TB = B if batch_tile is None else min(batch_tile, B)
    assert B % TB == 0, "batch_tile must divide the batch"

    kernel = functools.partial(_assembly_kernel, num_states=S, num_poses=P,
                               batch_tile=TB, l_pad=L_pad)

    out = pl.pallas_call(
        kernel,
        out_shape=jax.ShapeDtypeStruct((B, S), jnp.float32),
        grid_spec=pltpu.PrefetchScalarGridSpec(
            num_scalar_prefetch=0,
            grid=(B // TB,),
            in_specs=[
                pl.BlockSpec((TB * L_pad, K_pad), lambda b: (b, 0)),
                pl.BlockSpec((K_pad, N_pad), lambda b: (0, 0)),
            ],
            out_specs=pl.BlockSpec((TB, S), lambda b: (b, 0)),
        ),
        # "parallel" batch axis: shards grid steps across v7x's two TCs.
        compiler_params=pltpu.CompilerParams(
            dimension_semantics=("parallel",)),
    )(patches.astype(jnp.float32), T.astype(jnp.float32))

    return out[None]                                          # (1, B, S)


def reference(inputs, templates):
    """Pure-JAX reference identical to the PyTorch forward semantics."""
    x = inputs[0]                                             # (B, C, H, W)
    S, P, C, kH, kW = templates.shape
    B = x.shape[0]
    w = templates.reshape(S * P, C, kH, kW)
    out = lax.conv_general_dilated(
        x, w, window_strides=(1, 1), padding='VALID',
        dimension_numbers=('NCHW', 'OIHW', 'NCHW'))           # (B, S*P, oh, ow)
    oh, ow = out.shape[2], out.shape[3]
    out = out.reshape(B, S, P, oh, ow)
    out = out.max(axis=2)                                     # max over poses
    out = out.max(axis=-1)                                    # max over width
    out = out.max(axis=-1)                                    # max over height
    return out[None]                                          # (1, B, S)


if __name__ == "__main__":
    # TODO(synk): the TorchSceneRenderer template rendering in __init__ has no
    # Pallas equivalent; templates are synthesized deterministically instead.
    key = jax.random.PRNGKey(0)
    B, C, H, W = 2, 3, 16, 16     # batch, channels (RGB), image size
    S, P, kH, kW = 4, 6, 8, 8     # num_states, num_poses, template size

    k1, k2 = jax.random.split(key)
    inputs = jax.random.normal(k1, (1, B, C, H, W), dtype=jnp.float32)
    templates = jax.random.normal(k2, (S, P, C, kH, kW), dtype=jnp.float32)

    out = assembly_classifier_forward(inputs, templates)
    out = jax.block_until_ready(out)

    ref = reference(inputs, templates)
    assert out.shape == (1, B, S)
    np.testing.assert_allclose(np.asarray(out), np.asarray(ref),
                               rtol=1e-4, atol=1e-4)
    print("KERNEL_OK")
</pallas_src>

<mosaic_0001>
module attributes {stable_mosaic.version = 11 : i64} {
  func.func @_assembly_kernel(%arg0: i32, %arg1: memref<176x256xf32, #tpu.memory_space<vmem>>, %arg2: memref<256x128xf32, #tpu.memory_space<vmem>>, %arg3: memref<2x4xf32, #tpu.memory_space<vmem>>) attributes {dimension_semantics = [#tpu.dimension_semantics<parallel>], iteration_bounds = array<i64: 1>, scalar_prefetch = 0 : i64, scratch_operands = 0 : i64, tpu.core_type = #tpu.core_type<tc>, window_params = [{transform_indices = @transform_0, window_bounds = array<i64: 176, 256>}, {pipeline_mode = #tpu.pipeline_mode<synchronous>, transform_indices = @transform_1, window_bounds = array<i64: 256, 128>}, {transform_indices = @transform_2, window_bounds = array<i64: 2, 4>}]} {
    %c0 = arith.constant 0 : index
    %c0_0 = arith.constant 0 : index
    %0 = vector.load %arg1[%c0, %c0_0] : memref<176x256xf32, #tpu.memory_space<vmem>>, vector<176x256xf32>
    %c0_1 = arith.constant 0 : index
    %c0_2 = arith.constant 0 : index
    %1 = vector.load %arg2[%c0_1, %c0_2] : memref<256x128xf32, #tpu.memory_space<vmem>>, vector<256x128xf32>
    %cst = arith.constant dense<0.000000e+00> : vector<176x128xf32>
    %2 = tpu.matmul %0, %1, %cst {dimension_numbers = #tpu.dot_dimension_numbers<[1], [0], [0], [1], [0, 0, 1, 1], [], []>} : vector<176x256xf32>, vector<256x128xf32>, vector<176x128xf32> -> vector<176x128xf32>
    %3 = vector.shape_cast %2 : vector<176x128xf32> to vector<2x88x128xf32>
    %cst_3 = arith.constant dense<0xFF800000> : vector<2x128xf32>
    %4 = vector.multi_reduction <maximumf>, %3, %cst_3 [1] : vector<2x88x128xf32> to vector<2x128xf32>
    %5 = tpu.iota {dimensions = array<i32: 1>} : vector<2x128xi32>
    %6 = tpu.iota {dimensions = array<i32: 1>} : vector<2x4xi32>
    %cst_4 = arith.constant 0xFF800000 : f32
    %7 = vector.broadcast %cst_4 : f32 to vector<2x4xf32>
    %c0_i32 = arith.constant 0 : i32
    %8 = vector.broadcast %c0_i32 : i32 to vector<2x128xi32>
    %9 = arith.cmpi sge, %5, %8 : vector<2x128xi32>
    %c6_i32 = arith.constant 6 : i32
    %10 = vector.broadcast %c6_i32 : i32 to vector<2x128xi32>
    %11 = arith.cmpi slt, %5, %10 : vector<2x128xi32>
    %12 = arith.andi %9, %11 : vector<2x128xi1>
    %cst_5 = arith.constant 0xFF800000 : f32
    %13 = vector.broadcast %cst_5 : f32 to vector<2x128xf32>
    %14 = arith.select %12, %4, %13 : vector<2x128xi1>, vector<2x128xf32>
    %cst_6 = arith.constant dense<0xFF800000> : vector<2xf32>
    %15 = vector.multi_reduction <maximumf>, %14, %cst_6 [1] : vector<2x128xf32> to vector<2xf32>
    %16 = vector.shape_cast %15 : vector<2xf32> to vector<2x1xf32>
    %c0_i32_7 = arith.constant 0 : i32
    %17 = vector.broadcast %c0_i32_7 : i32 to vector<2x4xi32>
    %18 = arith.cmpi eq, %6, %17 : vector<2x4xi32>
    %19 = vector.shape_cast %16 : vector<2x1xf32> to vector<2x1xf32>
    %20 = vector.broadcast %19 : vector<2x1xf32> to vector<2x4xf32>
    %21 = arith.select %18, %20, %7 : vector<2x4xi1>, vector<2x4xf32>
    %c6_i32_8 = arith.constant 6 : i32
    %22 = vector.broadcast %c6_i32_8 : i32 to vector<2x128xi32>
    %23 = arith.cmpi sge, %5, %22 : vector<2x128xi32>
    %c12_i32 = arith.constant 12 : i32
    %24 = vector.broadcast %c12_i32 : i32 to vector<2x128xi32>
    %25 = arith.cmpi slt, %5, %24 : vector<2x128xi32>
    %26 = arith.andi %23, %25 : vector<2x128xi1>
    %cst_9 = arith.constant 0xFF800000 : f32
    %27 = vector.broadcast %cst_9 : f32 to vector<2x128xf32>
    %28 = arith.select %26, %4, %27 : vector<2x128xi1>, vector<2x128xf32>
    %cst_10 = arith.constant dense<0xFF800000> : vector<2xf32>
    %29 = vector.multi_reduction <maximumf>, %28, %cst_10 [1] : vector<2x128xf32> to vector<2xf32>
    %30 = vector.shape_cast %29 : vector<2xf32> to vector<2x1xf32>
    %c1_i32 = arith.constant 1 : i32
    %31 = vector.broadcast %c1_i32 : i32 to vector<2x4xi32>
    %32 = arith.cmpi eq, %6, %31 : vector<2x4xi32>
    %33 = vector.shape_cast %30 : vector<2x1xf32> to vector<2x1xf32>
    %34 = vector.broadcast %33 : vector<2x1xf32> to vector<2x4xf32>
    %35 = arith.select %32, %34, %21 : vector<2x4xi1>, vector<2x4xf32>
    %c12_i32_11 = arith.constant 12 : i32
    %36 = vector.broadcast %c12_i32_11 : i32 to vector<2x128xi32>
    %37 = arith.cmpi sge, %5, %36 : vector<2x128xi32>
    %c18_i32 = arith.constant 18 : i32
    %38 = vector.broadcast %c18_i32 : i32 to vector<2x128xi32>
    %39 = arith.cmpi slt, %5, %38 : vector<2x128xi32>
    %40 = arith.andi %37, %39 : vector<2x128xi1>
    %cst_12 = arith.constant 0xFF800000 : f32
    %41 = vector.broadcast %cst_12 : f32 to vector<2x128xf32>
    %42 = arith.select %40, %4, %41 : vector<2x128xi1>, vector<2x128xf32>
    %cst_13 = arith.constant dense<0xFF800000> : vector<2xf32>
    %43 = vector.multi_reduction <maximumf>, %42, %cst_13 [1] : vector<2x128xf32> to vector<2xf32>
    %44 = vector.shape_cast %43 : vector<2xf32> to vector<2x1xf32>
    %c2_i32 = arith.constant 2 : i32
    %45 = vector.broadcast %c2_i32 : i32 to vector<2x4xi32>
    %46 = arith.cmpi eq, %6, %45 : vector<2x4xi32>
    %47 = vector.shape_cast %44 : vector<2x1xf32> to vector<2x1xf32>
    %48 = vector.broadcast %47 : vector<2x1xf32> to vector<2x4xf32>
    %49 = arith.select %46, %48, %35 : vector<2x4xi1>, vector<2x4xf32>
    %c18_i32_14 = arith.constant 18 : i32
    %50 = vector.broadcast %c18_i32_14 : i32 to vector<2x128xi32>
    %51 = arith.cmpi sge, %5, %50 : vector<2x128xi32>
    %c24_i32 = arith.constant 24 : i32
    %52 = vector.broadcast %c24_i32 : i32 to vector<2x128xi32>
    %53 = arith.cmpi slt, %5, %52 : vector<2x128xi32>
    %54 = arith.andi %51, %53 : vector<2x128xi1>
    %cst_15 = arith.constant 0xFF800000 : f32
    %55 = vector.broadcast %cst_15 : f32 to vector<2x128xf32>
    %56 = arith.select %54, %4, %55 : vector<2x128xi1>, vector<2x128xf32>
    %cst_16 = arith.constant dense<0xFF800000> : vector<2xf32>
    %57 = vector.multi_reduction <maximumf>, %56, %cst_16 [1] : vector<2x128xf32> to vector<2xf32>
    %58 = vector.shape_cast %57 : vector<2xf32> to vector<2x1xf32>
    %c3_i32 = arith.constant 3 : i32
    %59 = vector.broadcast %c3_i32 : i32 to vector<2x4xi32>
    %60 = arith.cmpi eq, %6, %59 : vector<2x4xi32>
    %61 = vector.shape_cast %58 : vector<2x1xf32> to vector<2x1xf32>
    %62 = vector.broadcast %61 : vector<2x1xf32> to vector<2x4xf32>
    %63 = arith.select %60, %62, %49 : vector<2x4xi1>, vector<2x4xf32>
    %c0_17 = arith.constant 0 : index
    %c0_18 = arith.constant 0 : index
    %64 = vector.load %arg3[%c0_17, %c0_18] : memref<2x4xf32, #tpu.memory_space<vmem>>, vector<2x4xf32>
    tpu.vector_store %arg3[%c0_17, %c0_18], %63 {strides = array<i32>} : memref<2x4xf32, #tpu.memory_space<vmem>>, vector<2x4xf32>,
    return
  }
  func.func @transform_0(%arg0: i32) -> (i32, i32) {
    %c0_i32 = arith.constant 0 : i32
    %c0_i32_0 = arith.constant 0 : i32
    return %arg0, %c0_i32 : i32, i32
  }
  func.func @transform_1(%arg0: i32) -> (i32, i32) {
    %c0_i32 = arith.constant 0 : i32
    %c0_i32_0 = arith.constant 0 : i32
    %c0_i32_1 = arith.constant 0 : i32
    return %c0_i32, %c0_i32_0 : i32, i32
  }
  func.func @transform_2(%arg0: i32) -> (i32, i32) {
    %c0_i32 = arith.constant 0 : i32
    %c0_i32_0 = arith.constant 0 : i32
    return %arg0, %c0_i32 : i32, i32
  }
}

</mosaic_0001>

<bundles_post_ra>
// kernel: tpu_custom_call.1
= control target key start
LH: loop header
LB: loop body
LE: loop exit
PB: predicated region body
PF: predicated region fallthrough
CT: control target
= control target key end

     0   :  { %7 = vsyncpa [#allocation3], 0  ;;  %s540_s0 = inlined_call_operand.hbm [shape: f32[176,256], index: 0, kind: input, shape index: {}]   ;;  %s541_s1 = inlined_call_operand.hbm [shape: f32[256,128], index: 1, kind: input, shape index: {}]   ;;  %s542_s2 = inlined_call_operand.hbm [shape: f32[2,4], index: 2, kind: output, shape index: {}]  }
   0x1   :  { %8 = vsyncpa [#allocation6], 0 }
   0x2   :  { %9 = vsyncpa [#allocation4], 0  ;;  %s14_s11 = sshll.u32 %s540_s0, 4  ;;  %s499_s12 = smov [#allocation2]   ;;  %s15_s11 = int_to_ptr.hbm [resolvable:$true] %s14_s11 }
   0x3   :  { %s16_s13 = sshll.u32 %s499_s12, 4  ;;  %s27_s16 = sshll.u32 %s541_s1, 4  ;;  %s17_s13 = int_to_ptr.vmem [resolvable:$true] %s16_s13  ;;  %s28_s16 = int_to_ptr.hbm [resolvable:$true] %s27_s16 }
   0x4   :  { %s500_s17 = smov 256   ;;  %s501_s18 = smov 16  }
   0x5   :  { %22 = dma.hbm_to_vmem [thread:$0]  %s15_s11, 5632, %s17_s13, [#allocation3], %s500_s17, %s500_s17, %s501_s18  }
   0x6   :  { %s502_s19 = smov [#allocation5]   ;;  %s503_s21 = smov 128  }
   0x7   :  { %s29_s20 = sshll.u32 %s502_s19, 4  ;;  %s504_s22 = smov 8   ;;  %s30_s20 = int_to_ptr.vmem [resolvable:$true] %s29_s20 }
   0x8   :  { %35 = dma.hbm_to_vmem [thread:$0]  %s28_s16, 4096, %s30_s20, [#allocation6], %s503_s21, %s503_s21, %s504_s22  }
   0x9   :  { %493 = dma.done.wait [#allocation3], 5632  }
   0xa   :  { %494 = vsyncadd [#allocation3], 4294961664 }
   0xb   :  { %495 = dma.done.wait [#allocation6], 4096  }
   0xc   :  { %496 = vsyncadd [#allocation6], 4294963200  ;;  %v103_v0 = vld [vmem:[#allocation5 + $0x78] sm:$0xff]  ;;  %v102_v2 = vld [vmem:[#allocation5 + $0x70] sm:$0xff]  ;;  %vm325_vm2 = vcmask 1041409   ;;  %vm329_vm5 = vcmask 1041408  }
   0xd   :  { %v119_v1 = vld [vmem:[#allocation5 + $0xf8] sm:$0xff]  ;;  %120 = vmatpush.msra.mxu0 %v103_v0  ;;  %382 = vmatpush.msra.mxu2 %v103_v0  ;;  %v118_v3 = vld [vmem:[#allocation5 + $0xf0] sm:$0xff]  ;;  %v101_v4 = vld [vmem:[#allocation5 + $0x68] sm:$0xff]  ;;  %s505_s0 = smov [#allocation7]   ;;  %s371_s25 = sshll.u32 %s542_s2, 4  ;;  %s372_s25 = int_to_ptr.hbm [resolvable:$true] %s371_s25 }
   0xe   :  { %203 = vmatpush.msra.mxu1 %v119_v1  ;;  %398 = vmatpush.msra.mxu3 %v119_v1  ;;  %v117_v5 = vld [vmem:[#allocation5 + $0xe8] sm:$0xff]  ;;  %v100_v6 = vld [vmem:[#allocation5 + $0x60] sm:$0xff]  ;;  %v99_v8 = vld [vmem:[#allocation5 + $0x58] sm:$0xff]  ;;  %s369_s1 = sshll.u32 %s505_s0, 4  ;;  %s370_s1 = int_to_ptr.vmem [resolvable:$true] %s369_s1 }
   0xf   :  { %121 = vmatpush.msra.mxu0 %v102_v2  ;;  %383 = vmatpush.msra.mxu2 %v102_v2  ;;  %v116_v7 = vld [vmem:[#allocation5 + $0xe0] sm:$0xff]  ;;  %v115_v9 = vld [vmem:[#allocation5 + $0xd8] sm:$0xff]  ;;  %v98_v10 = vld [vmem:[#allocation5 + $0x50] sm:$0xff] }
  0x10   :  { %204 = vmatpush.msra.mxu1 %v118_v3  ;;  %399 = vmatpush.msra.mxu3 %v118_v3  ;;  %v114_v11 = vld [vmem:[#allocation5 + $0xd0] sm:$0xff]  ;;  %v97_v12 = vld [vmem:[#allocation5 + $0x48] sm:$0xff]  ;;  %v96_v14 = vld [vmem:[#allocation5 + $0x40] sm:$0xff] }
  0x11   :  { %122 = vmatpush.msra.mxu0 %v101_v4  ;;  %384 = vmatpush.msra.mxu2 %v101_v4  ;;  %v113_v13 = vld [vmem:[#allocation5 + $0xc8] sm:$0xff]  ;;  %v112_v15 = vld [vmem:[#allocation5 + $0xc0] sm:$0xff]  ;;  %v95_v16 = vld [vmem:[#allocation5 + $0x38] sm:$0xff] }
  0x12   :  { %205 = vmatpush.msra.mxu1 %v117_v5  ;;  %400 = vmatpush.msra.mxu3 %v117_v5  ;;  %v111_v17 = vld [vmem:[#allocation5 + $0xb8] sm:$0xff]  ;;  %v94_v18 = vld [vmem:[#allocation5 + $0x30] sm:$0xff]  ;;  %v93_v20 = vld [vmem:[#allocation5 + $0x28] sm:$0xff] }
  0x13   :  { %123 = vmatpush.msra.mxu0 %v100_v6  ;;  %385 = vmatpush.msra.mxu2 %v100_v6  ;;  %v110_v19 = vld [vmem:[#allocation5 + $0xb0] sm:$0xff]  ;;  %v109_v21 = vld [vmem:[#allocation5 + $0xa8] sm:$0xff]  ;;  %v92_v22 = vld [vmem:[#allocation5 + $0x20] sm:$0xff] }
  0x14   :  { %206 = vmatpush.msra.mxu1 %v116_v7  ;;  %401 = vmatpush.msra.mxu3 %v116_v7  ;;  %v108_v23 = vld [vmem:[#allocation5 + $0xa0] sm:$0xff]  ;;  %v91_v24 = vld [vmem:[#allocation5 + $0x18] sm:$0xff]  ;;  %v90_v26 = vld [vmem:[#allocation5 + $0x10] sm:$0xff] }
  0x15   :  { %124 = vmatpush.msra.mxu0 %v99_v8  ;;  %386 = vmatpush.msra.mxu2 %v99_v8  ;;  %v107_v25 = vld [vmem:[#allocation5 + $0x98] sm:$0xff]  ;;  %v106_v27 = vld [vmem:[#allocation5 + $0x90] sm:$0xff]  ;;  %v89_v28 = vld [vmem:[#allocation5 + $0x8] sm:$0xff] }
  0x16   :  { %207 = vmatpush.msra.mxu1 %v115_v9  ;;  %402 = vmatpush.msra.mxu3 %v115_v9  ;;  %v105_v29 = vld [vmem:[#allocation5 + $0x88] sm:$0xff]  ;;  %v88_v30 = vld [vmem:[#allocation5] sm:$0xff]  ;;  %v66_v33 = vld [vmem:[#allocation2 + $0xb0] sm:$0xff] }
  0x17   :  { %125 = vmatpush.msra.mxu0 %v98_v10  ;;  %387 = vmatpush.msra.mxu2 %v98_v10  ;;  %v104_v31 = vld [vmem:[#allocation5 + $0x80] sm:$0xff]  ;;  %v45_v34 = vld [vmem:[#allocation2 + $0x8] sm:$0xff]  ;;  %v67_v35 = vld [vmem:[#allocation2 + $0xb8] sm:$0xff] }
  0x18   :  { %208 = vmatpush.msra.mxu1 %v114_v11  ;;  %403 = vmatpush.msra.mxu3 %v114_v11  ;;  %v44_v32 = vld [vmem:[#allocation2] sm:$0xff]  ;;  %v46_v36 = vld [vmem:[#allocation2 + $0x10] sm:$0xff]  ;;  %v47_v38 = vld [vmem:[#allocation2 + $0x18] sm:$0xff] }
  0x19   :  { %126 = vmatpush.msra.mxu0 %v97_v12  ;;  %388 = vmatpush.msra.mxu2 %v97_v12  ;;  %v68_v37 = vld [vmem:[#allocation2 + $0xc0] sm:$0xff]  ;;  %v69_v39 = vld [vmem:[#allocation2 + $0xc8] sm:$0xff]  ;;  %v70_v41 = vld [vmem:[#allocation2 + $0xd0] sm:$0xff] }
  0x1a   :  { %209 = vmatpush.msra.mxu1 %v113_v13  ;;  %404 = vmatpush.msra.mxu3 %v113_v13  ;;  %v48_v40 = vld [vmem:[#allocation2 + $0x20] sm:$0xff]  ;;  %v49_v42 = vld [vmem:[#allocation2 + $0x28] sm:$0xff]  ;;  %v71_v43 = vld [vmem:[#allocation2 + $0xd8] sm:$0xff] }
  0x1b   :  { %127 = vmatpush.msra.mxu0 %v96_v14  ;;  %389 = vmatpush.msra.mxu2 %v96_v14  ;;  %v50_v44 = vld [vmem:[#allocation2 + $0x30] sm:$0xff]  ;;  %v72_v45 = vld [vmem:[#allocation2 + $0xe0] sm:$0xff]  ;;  %v51_v46 = vld [vmem:[#allocation2 + $0x38] sm:$0xff] }
  0x1c   :  { %210 = vmatpush.msra.mxu1 %v112_v15  ;;  %405 = vmatpush.msra.mxu3 %v112_v15  ;;  %v73_v47 = vld [vmem:[#allocation2 + $0xe8] sm:$0xff]  ;;  %v52_v48 = vld [vmem:[#allocation2 + $0x40] sm:$0xff]  ;;  %v74_v49 = vld [vmem:[#allocation2 + $0xf0] sm:$0xff] }
  0x1d   :  { %128 = vmatpush.msra.mxu0 %v95_v16  ;;  %390 = vmatpush.msra.mxu2 %v95_v16  ;;  %v53_v50 = vld [vmem:[#allocation2 + $0x48] sm:$0xff]  ;;  %v75_v51 = vld [vmem:[#allocation2 + $0xf8] sm:$0xff]  ;;  %v54_v52 = vld [vmem:[#allocation2 + $0x50] sm:$0xff] }
  0x1e   :  { %211 = vmatpush.msra.mxu1 %v111_v17  ;;  %406 = vmatpush.msra.mxu3 %v111_v17  ;;  %v76_v53 = vld [vmem:[#allocation2 + $0x100] sm:$0xff]  ;;  %v55_v54 = vld [vmem:[#allocation2 + $0x58] sm:$0xff]  ;;  %v77_v55 = vld [vmem:[#allocation2 + $0x108] sm:$0xff] }
  0x1f   :  { %129 = vmatpush.msra.mxu0 %v94_v18  ;;  %391 = vmatpush.msra.mxu2 %v94_v18  ;;  %v56_v56 = vld [vmem:[#allocation2 + $0x60] sm:$0xff]  ;;  %v78_v57 = vld [vmem:[#allocation2 + $0x110] sm:$0xff]  ;;  %v57_v58 = vld [vmem:[#allocation2 + $0x68] sm:$0xff] }
  0x20   :  { %212 = vmatpush.msra.mxu1 %v110_v19  ;;  %407 = vmatpush.msra.mxu3 %v110_v19  ;;  %v79_v59 = vld [vmem:[#allocation2 + $0x118] sm:$0xff]  ;;  %v58_v60 = vld [vmem:[#allocation2 + $0x70] sm:$0xff]  ;;  %v80_v61 = vld [vmem:[#allocation2 + $0x120] sm:$0xff] }
  0x21   :  { %130 = vmatpush.msra.mxu0 %v93_v20  ;;  %392 = vmatpush.msra.mxu2 %v93_v20  ;;  %v59_v62 = vld [vmem:[#allocation2 + $0x78] sm:$0xff]  ;;  %v81_v63 = vld [vmem:[#allocation2 + $0x128] sm:$0xff]  ;;  %v60_v0 = vld [vmem:[#allocation2 + $0x80] sm:$0xff] }
  0x22   :  { %213 = vmatpush.msra.mxu1 %v109_v21  ;;  %408 = vmatpush.msra.mxu3 %v109_v21  ;;  %v82_v1 = vld [vmem:[#allocation2 + $0x130] sm:$0xff]  ;;  %v61_v2 = vld [vmem:[#allocation2 + $0x88] sm:$0xff]  ;;  %v83_v3 = vld [vmem:[#allocation2 + $0x138] sm:$0xff] }
  0x23   :  { %131 = vmatpush.msra.mxu0 %v92_v22  ;;  %393 = vmatpush.msra.mxu2 %v92_v22  ;;  %v62_v4 = vld [vmem:[#allocation2 + $0x90] sm:$0xff]  ;;  %v84_v5 = vld [vmem:[#allocation2 + $0x140] sm:$0xff]  ;;  %v63_v6 = vld [vmem:[#allocation2 + $0x98] sm:$0xff] }
  0x24   :  { %214 = vmatpush.msra.mxu1 %v108_v23  ;;  %409 = vmatpush.msra.mxu3 %v108_v23  ;;  %v85_v7 = vld [vmem:[#allocation2 + $0x148] sm:$0xff]  ;;  %v64_v8 = vld [vmem:[#allocation2 + $0xa0] sm:$0xff]  ;;  %v86_v9 = vld [vmem:[#allocation2 + $0x150] sm:$0xff] }
  0x25   :  { %132 = vmatpush.msra.mxu0 %v91_v24  ;;  %394 = vmatpush.msra.mxu2 %v91_v24  ;;  %v65_v10 = vld [vmem:[#allocation2 + $0xa8] sm:$0xff]  ;;  %v87_v11 = vld [vmem:[#allocation2 + $0x158] sm:$0xff] }
  0x26   :  { %215 = vmatpush.msra.mxu1 %v107_v25  ;;  %410 = vmatpush.msra.mxu3 %v107_v25 }
  0x27   :  { %133 = vmatpush.msra.mxu0 %v90_v26  ;;  %395 = vmatpush.msra.mxu2 %v90_v26 }
  0x28   :  { %216 = vmatpush.msra.mxu1 %v106_v27  ;;  %411 = vmatpush.msra.mxu3 %v106_v27 }
  0x29   :  { %134 = vmatpush.msra.mxu0 %v89_v28  ;;  %396 = vmatpush.msra.mxu2 %v89_v28 }
  0x2a   :  { %217 = vmatpush.msra.mxu1 %v105_v29  ;;  %412 = vmatpush.msra.mxu3 %v105_v29 }
  0x2b   :  { %135 = vmatpush.msra.mxu0 %v88_v30  ;;  %397 = vmatpush.msra.mxu2 %v88_v30 }
  0x2c   :  { %218 = vmatpush.msra.mxu1 %v104_v31  ;;  %413 = vmatpush.msra.mxu3 %v104_v31 }
  0x2d   :  { %136 = vmatmul.f32.vlgmr.msra.gmra.mxu0 %v44_v32  ;;  %169 = vmatmul.f32.vlgmr.msra.gmra.mxu2 %v66_v33 }
  0x2e   :  { %219 = vmatmul.f32.vlgmr.msra.gmra.mxu1 %v45_v34  ;;  %252 = vmatmul.f32.vlgmr.msra.gmra.mxu3 %v67_v35 }
  0x35   :  { %139 = vmatmul.f32.gmra.mxu0 %v46_v36  ;;  %172 = vmatmul.f32.gmra.mxu2 %v68_v37 }
  0x36   :  { %222 = vmatmul.f32.gmra.mxu1 %v47_v38  ;;  %255 = vmatmul.f32.gmra.mxu3 %v69_v39 }
  0x3d   :  { %142 = vmatmul.f32.gmra.mxu0 %v48_v40  ;;  %175 = vmatmul.f32.gmra.mxu2 %v70_v41 }
  0x3e   :  { %225 = vmatmul.f32.gmra.mxu1 %v49_v42  ;;  %258 = vmatmul.f32.gmra.mxu3 %v71_v43 }
  0x45   :  { %145 = vmatmul.f32.gmra.mxu0 %v50_v44  ;;  %178 = vmatmul.f32.gmra.mxu2 %v72_v45 }
  0x46   :  { %228 = vmatmul.f32.gmra.mxu1 %v51_v46  ;;  %261 = vmatmul.f32.gmra.mxu3 %v73_v47 }
  0x4d   :  { %148 = vmatmul.f32.gmra.mxu0 %v52_v48  ;;  %181 = vmatmul.f32.gmra.mxu2 %v74_v49 }
  0x4e   :  { %231 = vmatmul.f32.gmra.mxu1 %v53_v50  ;;  %264 = vmatmul.f32.gmra.mxu3 %v75_v51 }
  0x55   :  { %151 = vmatmul.f32.gmra.mxu0 %v54_v52  ;;  %184 = vmatmul.f32.gmra.mxu2 %v76_v53 }
  0x56   :  { %234 = vmatmul.f32.gmra.mxu1 %v55_v54  ;;  %267 = vmatmul.f32.gmra.mxu3 %v77_v55 }
  0x5d   :  { %154 = vmatmul.f32.gmra.mxu0 %v56_v56  ;;  %187 = vmatmul.f32.gmra.mxu2 %v78_v57 }
  0x5e   :  { %237 = vmatmul.f32.gmra.mxu1 %v57_v58  ;;  %270 = vmatmul.f32.gmra.mxu3 %v79_v59 }
  0x65   :  { %157 = vmatmul.f32.gmra.mxu0 %v58_v60  ;;  %190 = vmatmul.f32.gmra.mxu2 %v80_v61 }
  0x66   :  { %240 = vmatmul.f32.gmra.mxu1 %v59_v62  ;;  %273 = vmatmul.f32.gmra.mxu3 %v81_v63 }
  0x6d   :  { %160 = vmatmul.f32.gmra.mxu0 %v60_v0  ;;  %193 = vmatmul.f32.gmra.mxu2 %v82_v1 }
  0x6e   :  { %243 = vmatmul.f32.gmra.mxu1 %v61_v2  ;;  %276 = vmatmul.f32.gmra.mxu3 %v83_v3 }
  0x75   :  { %163 = vmatmul.f32.gmra.mxu0 %v62_v4  ;;  %196 = vmatmul.f32.gmra.mxu2 %v84_v5 }
  0x76   :  { %246 = vmatmul.f32.gmra.mxu1 %v63_v6  ;;  %279 = vmatmul.f32.gmra.mxu3 %v85_v7 }
  0x7d   :  { %166 = vmatmul.f32.gmra.mxu0 %v64_v8  ;;  %199 = vmatmul.f32.gmra.mxu2 %v86_v9 }
  0x7e   :  { %249 = vmatmul.f32.gmra.mxu1 %v65_v10  ;;  %282 = vmatmul.f32.gmra.mxu3 %v87_v11 }
  0xaa   :  { %v137_v12 = vpop.f32.mrf.mxu0 }
  0xab   :  { %v220_v13 = vpop.f32.mrf.mxu1 }
  0xac   :  { %v221_v14 = vadd.f32 %v220_v13, %v137_v12 }
  0xb0   :  { %v170_v15 = vpop.f32.mrf.mxu2 }
  0xb1   :  { %v253_v16 = vpop.f32.mrf.mxu3 }
  0xb2   :  { %v527_v17 = vadd.f32 %v253_v16, %v170_v15  ;;  %v140_v18 = vpop.f32.mrf.mxu0 }
  0xb3   :  { %v223_v19 = vpop.f32.mrf.mxu1 }
  0xb4   :  { %v224_v20 = vadd.f32 %v223_v19, %v140_v18 }
  0xb8   :  { %v173_v21 = vpop.f32.mrf.mxu2 }
  0xb9   :  { %v256_v22 = vpop.f32.mrf.mxu3 }
  0xba   :  { %v529_v23 = vadd.f32 %v256_v22, %v173_v21  ;;  %v143_v24 = vpop.f32.mrf.mxu0 }
  0xbb   :  { %v226_v25 = vpop.f32.mrf.mxu1 }
  0xbc   :  { %v227_v52 = vadd.f32 %v226_v25, %v143_v24 }
  0xbe   :  { %v286_v57 = vmax.f32 %v221_v14, %v227_v52 }
  0xc0   :  { %v176_v26 = vpop.f32.mrf.mxu2 }
  0xc1   :  { %v259_v27 = vpop.f32.mrf.mxu3 }
  0xc2   :  { %v146_v28 = vpop.f32.mrf.mxu0  ;;  %v260_v60 = vadd.f32 %v259_v27, %v176_v26 }
  0xc3   :  { %v229_v29 = vpop.f32.mrf.mxu1 }
  0xc4   :  { %v230_v55 = vadd.f32 %v229_v29, %v146_v28  ;;  %v302_v9 = vmax.f32 %v527_v17, %v260_v60 }
  0xc6   :  { %v287_v61 = vmax.f32 %v224_v20, %v230_v55 }
  0xc8   :  { %v179_v30 = vpop.f32.mrf.mxu2 }
  0xc9   :  { %v262_v31 = vpop.f32.mrf.mxu3 }
  0xca   :  { %v149_v32 = vpop.f32.mrf.mxu0  ;;  %v263_v2 = vadd.f32 %v262_v31, %v179_v30 }
  0xcb   :  { %v232_v33 = vpop.f32.mrf.mxu1 }
  0xcc   :  { %v233_v56 = vadd.f32 %v232_v33, %v149_v32  ;;  %v303_v16 = vmax.f32 %v529_v23, %v263_v2 }
  0xce   :  { %v288_v62 = vmax.f32 %v286_v57, %v233_v56 }
  0xd0   :  { %v182_v34 = vpop.f32.mrf.mxu2 }
  0xd1   :  { %v265_v35 = vpop.f32.mrf.mxu3 }
  0xd2   :  { %v152_v36 = vpop.f32.mrf.mxu0  ;;  %v266_v3 = vadd.f32 %v265_v35, %v182_v34 }
  0xd3   :  { %v235_v37 = vpop.f32.mrf.mxu1 }
  0xd4   :  { %v236_v58 = vadd.f32 %v235_v37, %v152_v36  ;;  %v304_v18 = vmax.f32 %v302_v9, %v266_v3  ;;  %v318_v37 = vlaneseq }
  0xd6   :  { %v289_v5 = vmax.f32 %v287_v61, %v236_v58 }
  0xd8   :  { %v185_v38 = vpop.f32.mrf.mxu2 }
  0xd9   :  { %v268_v39 = vpop.f32.mrf.mxu3 }
  0xda   :  { %v155_v40 = vpop.f32.mrf.mxu0  ;;  %v269_v10 = vadd.f32 %v268_v39, %v185_v38 }
  0xdb   :  { %v238_v41 = vpop.f32.mrf.mxu1 }
  0xdc   :  { %v239_v59 = vadd.f32 %v238_v41, %v155_v40  ;;  %v305_v24 = vmax.f32 %v303_v16, %v269_v10  ;;  %v319_v41 = vand.u32 127, %v318_v37 }
  0xde   :  { %v290_v6 = vmax.f32 %v288_v62, %v239_v59  ;;  %vm344_vm0 = vcmp.ge.s32.totalorder %v319_v41, 12  ;;  %vm345_vm1 = vcmp.lt.s32.totalorder %v319_v41, 18  ;;  %vm321_vm4 = vcmp.lt.s32.totalorder %v319_v41, 6 }
  0xdf   :  { %vm346_vm3 = vmand %vm344_vm0, %vm345_vm1  ;;  %vm353_vm6 = vcmp.ge.s32.totalorder %v319_v41, 18  ;;  %vm354_vm7 = vcmp.lt.s32.totalorder %v319_v41, 24  ;;  %vm335_vm8 = vcmp.ge.s32.totalorder %v319_v41, 6  ;;  %vm336_vm9 = vcmp.lt.s32.totalorder %v319_v41, 12 }
  0xe0   :  { %v188_v42 = vpop.f32.mrf.mxu2  ;;  %vm355_vm10 = vmand %vm353_vm6, %vm354_vm7  ;;  %vm333_vm12 = vcmp.eq.s32.totalorder %v319_v41, 0  ;;  %vm342_vm13 = vcmp.eq.s32.totalorder %v319_v41, 1  ;;  %vm351_vm14 = vcmp.eq.s32.totalorder %v319_v41, 2  ;;  %vm360_vm15 = vcmp.eq.s32.totalorder %v319_v41, 3 }
  0xe1   :  { %v271_v43 = vpop.f32.mrf.mxu3  ;;  %vm337_vm11 = vmand %vm335_vm8, %vm336_vm9  ;;  %vm362_vm0 = vcmask 25600  }
  0xe2   :  { %v158_v44 = vpop.f32.mrf.mxu0  ;;  %v272_v12 = vadd.f32 %v271_v43, %v188_v42 }
  0xe3   :  { %v241_v45 = vpop.f32.mrf.mxu1 }
  0xe4   :  { %v242_v63 = vadd.f32 %v241_v45, %v158_v44  ;;  %v306_v25 = vmax.f32 %v304_v18, %v272_v12 }
  0xe6   :  { %v291_v13 = vmax.f32 %v289_v5, %v242_v63 }
  0xe8   :  { %v191_v46 = vpop.f32.mrf.mxu2 }
  0xe9   :  { %v274_v47 = vpop.f32.mrf.mxu3 }
  0xea   :  { %v161_v48 = vpop.f32.mrf.mxu0  ;;  %v275_v19 = vadd.f32 %v274_v47, %v191_v46 }
  0xeb   :  { %v244_v49 = vpop.f32.mrf.mxu1 }
  0xec   :  { %v245_v0 = vadd.f32 %v244_v49, %v161_v48  ;;  %v307_v17 = vmax.f32 %v305_v24, %v275_v19 }
  0xee   :  { %v292_v14 = vmax.f32 %v290_v6, %v245_v0 }
  0xf0   :  { %v194_v50 = vpop.f32.mrf.mxu2 }
  0xf1   :  { %v277_v51 = vpop.f32.mrf.mxu3 }
  0xf2   :  { %v164_v53 = vpop.f32.mrf.mxu0  ;;  %v278_v20 = vadd.f32 %v277_v51, %v194_v50 }
  0xf3   :  { %v247_v54 = vpop.f32.mrf.mxu1 }
  0xf4   :  { %v248_v7 = vadd.f32 %v247_v54, %v164_v53  ;;  %v308_v30 = vmax.f32 %v306_v25, %v278_v20 }
  0xf6   :  { %v293_v21 = vmax.f32 %v291_v13, %v248_v7 }
  0xf8   :  { %v197_v1 = vpop.f32.mrf.mxu2 }
  0xf9   :  { %v280_v4 = vpop.f32.mrf.mxu3 }
  0xfa   :  { %v167_v8 = vpop.f32.mrf.mxu0  ;;  %v281_v26 = vadd.f32 %v280_v4, %v197_v1 }
  0xfb   :  { %v250_v11 = vpop.f32.mrf.mxu1 }
  0xfc   :  { %v251_v15 = vadd.f32 %v250_v11, %v167_v8  ;;  %v309_v33 = vmax.f32 %v307_v17, %v281_v26 }
  0xfe   :  { %v294_v22 = vmax.f32 %v292_v14, %v251_v15 }
 0x100   :  { %v295_v27 = vmax.f32 %v294_v22, %v293_v21  ;;  %v200_v28 = vpop.f32.mrf.mxu2 }
 0x101   :  { %v283_v29 = vpop.f32.mrf.mxu3 }
 0x102   :  { %v296_v31 = vrot.slane %v295_v27, 4  ;;  %v284_v32 = vadd.f32 %v283_v29, %v200_v28 }
 0x104   :  { %v297_v34 = vmax.f32 %v295_v27, %v296_v31  ;;  %v310_v35 = vmax.f32 %v308_v30, %v284_v32 }
 0x106   :  { %v298_v36 = vrot.slane %v297_v34, 2  ;;  %v311_v23 = vmax.f32 %v310_v35, %v309_v33 }
 0x108   :  { %v312_v38 = vrot.slane %v311_v23, 4  ;;  %v299_v39 = vmax.f32 %v297_v34, %v298_v36 }
 0x10a   :  { %v313_v40 = vmax.f32 %v311_v23, %v312_v38  ;;  %v300_v43 = vrot.slane %v299_v39, 1 }
 0x10c   :  { %v314_v42 = vrot.slane %v313_v40, 2  ;;  %v301_v46 = vmax.f32 %v299_v39, %v300_v43 }
 0x10e   :  { %v315_v44 = vmax.f32 %v313_v40, %v314_v42 }
 0x110   :  { %v316_v45 = vrot.slane %v315_v44, 1 }
 0x112   :  { %v317_v47 = vmax.f32 %v315_v44, %v316_v45 }
 0x114   :  { %v326_v48 = vsel %vm325_vm2, %v317_v47, %v301_v46 }
 0x115   :  { %v347_v49 = vsel %vm346_vm3, %v326_v48, -inf  ;;  %v328_v50 = vsel %vm321_vm4, %v326_v48, -inf  ;;  %v356_v53 = vsel %vm355_vm10, %v326_v48, -inf  ;;  %v338_v54 = vsel %vm337_vm11, %v326_v48, -inf }
 0x116   :  { %v348_v51 = vsel %vm329_vm5, %v347_v49, -inf  ;;  %v330_v52 = vsel %vm329_vm5, %v328_v50, -inf  ;;  %v357_v55 = vsel %vm329_vm5, %v356_v53, -inf  ;;  %v339_v56 = vsel %vm329_vm5, %v338_v54, -inf }
 0x117   :  { %349 = vmax.xlane.f32.xlu1 %v348_v51  ;;  %331 = vmax.xlane.f32.xlu0 %v330_v52 }
 0x11f   :  { %358 = vmax.xlane.f32.xlu1 %v357_v55  ;;  %340 = vmax.xlane.f32.xlu0 %v339_v56 }
 0x18a   :  { %v350_v57 = vpop.xlane.xlu1 %349  ;;  %v332_v58 = vpop.xlane.xlu0 %331 }
 0x18b   :  { %v334_v59 = vsel %vm333_vm12, %v332_v58, -inf }
 0x192   :  { %v341_v60 = vpop.xlane.xlu0 %340  ;;  %v359_v62 = vpop.xlane.xlu1 %358 }
 0x193   :  { %v343_v61 = vsel %vm342_vm13, %v341_v60, %v334_v59 }
 0x194   :  { %v352_v63 = vsel %vm351_vm14, %v350_v57, %v343_v61 }
 0x195   :  { %v361_v0 = vsel %vm360_vm15, %v359_v62, %v352_v63 }
 0x196   :  { %363 = vst.msk [vmem:[#allocation7] sm:$0x3] %vm362_vm0, %v361_v0 }
 0x197   :  { %374 = dma.vmem_to_hbm [thread:$0]  %s370_s1, 32, %s372_s25, [#allocation4]  }
 0x198   :  { %497 = dma.done.wait [#allocation4], 32  }
 0x199   :  { %498 = vsyncadd [#allocation4], 4294967264 }
 0x19a   :  { %379 = vsyncpa [#allocation3], 1 }
 0x19b   :  { %380 = vsyncpa [#allocation6], 1 }
 0x19c   :  { %381 = vsyncpa [#allocation4], 1 }

</bundles_post_ra>
